<compile_context>
chip_gen: v6e
topology: v6e:2x2x1
jax: 0.10.0
libtpu: 0.0.40
codegen_flags: <defaults>
</compile_context>

<pallas_src>
import math

import jax
import jax.numpy as jnp
import numpy as np
from jax.experimental import pallas as pl
from jax.experimental.pallas import tpu as pltpu

_VMEM_LIMIT_BYTES = 48 * 1024 * 1024   # below v7x 64 MiB physical, raises v5e/v6e default


def _layernorm(x, gamma, beta, eps=1e-5):
    mean = jnp.mean(x, axis=-1, keepdims=True)
    var = jnp.mean(jnp.square(x - mean), axis=-1, keepdims=True)
    return (x - mean) * jax.lax.rsqrt(var + eps) * gamma + beta


def _gelu_exact(x):
    # PyTorch nn.GELU() default: exact erf formulation.
    return 0.5 * x * (1.0 + jax.lax.erf(x * (1.0 / math.sqrt(2.0))))


# ---------------------------------------------------------------------------
# Kernel 1: fused QKV projection.
#   x (1, TS, C) f32  @  Wqkv (C, 3C)  ->  q/k/v written head-major (1, N, TS, D).
#   Softmax scale is pre-folded into Wq / bq on the host, so no in-kernel scaling.
# ---------------------------------------------------------------------------
def qkv_proj_kernel(x_ref, wqkv_ref, bqkv_ref, q_ref, k_ref, v_ref):
    x = x_ref[0]                                   # (TS, C) f32
    _, C = x.shape
    _, n_heads, _, D = q_ref.shape

    xw = x.astype(wqkv_ref.dtype)
    qkv = jnp.dot(xw, wqkv_ref[...],
                  preferred_element_type=jnp.float32) + bqkv_ref[...]   # (TS, 3C) f32

    # Split into heads once here (paid once per token), so the attention kernel
    # sees a head-major layout and never slices lanes per head in its inner loop.
    for h in range(n_heads):
        q_ref[0, h] = qkv[:, h * D:(h + 1) * D].astype(q_ref.dtype)
        k_ref[0, h] = qkv[:, C + h * D:C + (h + 1) * D].astype(k_ref.dtype)
        v_ref[0, h] = qkv[:, 2 * C + h * D:2 * C + (h + 1) * D].astype(v_ref.dtype)


# ---------------------------------------------------------------------------
# Kernel 2: flash-style causal attention + output proj + residual + LN1 +
#           MLP(GELU) + residual + LN2 for one (batch, query-tile).
#   grid = (B, n_q_tiles, n_kv_tiles); KV axis is innermost / "arbitrary".
# ---------------------------------------------------------------------------
def attn_block_kernel(x_ref, q_ref, k_ref, v_ref,
                      wph_ref, bp_ref, g1_ref, be1_ref,
                      w1_ref, b1_ref, w2_ref, b2_ref, g2_ref, be2_ref,
                      o_ref, m_scr, l_scr, acc_scr):
    _, n_heads, t_q, D = q_ref.shape
    t_kv = k_ref.shape[2]
    C = x_ref.shape[2]

    qi = pl.program_id(1)
    ki = pl.program_id(2)
    n_kv = pl.num_programs(2)
    q_start = qi * t_q
    k_start = ki * t_kv

    @pl.when(ki == 0)
    def _init():
        m_scr[...] = jnp.full(m_scr.shape, -jnp.inf, dtype=m_scr.dtype)
        l_scr[...] = jnp.zeros(l_scr.shape, dtype=l_scr.dtype)
        acc_scr[...] = jnp.zeros(acc_scr.shape, dtype=acc_scr.dtype)

    def flash_update(apply_mask):
        q = q_ref[0]                               # (N, TQ, D), pre-scaled by 1/sqrt(D)
        k = k_ref[0]                               # (N, TK, D)
        v = v_ref[0]                               # (N, TK, D)
        s = jnp.einsum('nqd,nkd->nqk', q, k,
                       preferred_element_type=jnp.float32)      # (N, TQ, TK) f32
        if apply_mask:                             # only on diagonal tiles
            row = q_start + jax.lax.broadcasted_iota(jnp.int32, (t_q, t_kv), 0)
            col = k_start + jax.lax.broadcasted_iota(jnp.int32, (t_q, t_kv), 1)
            s = jnp.where((row >= col)[None, :, :], s, -jnp.inf)
        m_prev = m_scr[...]
        m_new = jnp.maximum(m_prev, jnp.max(s, axis=-1, keepdims=True))
        alpha = jnp.exp(m_prev - m_new)
        p = jnp.exp(s - m_new)
        l_scr[...] = alpha * l_scr[...] + jnp.sum(p, axis=-1, keepdims=True)
        acc_scr[...] = alpha * acc_scr[...] + jnp.einsum(
            'nqk,nkd->nqd', p.astype(v.dtype), v,
            preferred_element_type=jnp.float32)
        m_scr[...] = m_new

    # Skip fully-masked (above-diagonal) KV tiles; apply the causal mask only on
    # tiles straddling the diagonal.
    fully_visible = k_start + t_kv - 1 <= q_start
    on_diagonal = jnp.logical_and(k_start <= q_start + t_q - 1,
                                  k_start + t_kv - 1 > q_start)

    @pl.when(fully_visible)
    def _no_mask():
        flash_update(apply_mask=False)

    @pl.when(on_diagonal)
    def _with_mask():
        flash_update(apply_mask=True)

    # Epilogue: finish softmax, fuse head-merge into the output projection, then
    # residual + LN1 + MLP + residual + LN2 (all f32 math).
    @pl.when(ki == n_kv - 1)
    def _epilogue():
        x = x_ref[0]                                          # (TQ, C) f32
        inv_l = pl.reciprocal(l_scr[...], approx=True)        # (N, TQ, 1), EUP slot
        proj = jnp.zeros((t_q, C), jnp.float32)
        for h in range(n_heads):
            head = (acc_scr[h] * inv_l[h]).astype(wph_ref.dtype)   # (TQ, D)
            proj = proj + jnp.dot(head, wph_ref[h],
                                  preferred_element_type=jnp.float32)
        proj = proj + bp_ref[...]

        x1 = x + proj
        x1n = _layernorm(x1, g1_ref[...], be1_ref[...])

        hmid = jnp.dot(x1n.astype(w1_ref.dtype), w1_ref[...],
                       preferred_element_type=jnp.float32) + b1_ref[...]
        hmid = _gelu_exact(hmid)
        mlp = jnp.dot(hmid.astype(w2_ref.dtype), w2_ref[...],
                      preferred_element_type=jnp.float32) + b2_ref[...]
        x2 = x1n + mlp

        o_ref[0] = _layernorm(x2, g2_ref[...], be2_ref[...]).astype(o_ref.dtype)


def block_forward(x, params, n_heads, *, matmul_dtype=jnp.bfloat16, seq_tile=None):
    (wq, bq, wk, bk, wv, bv, wp, bp,
     g1, be1, w1, b1, w2, b2, g2, be2) = params
    B, T, C = x.shape
    assert C % n_heads == 0
    D = C // n_heads
    H = w1.shape[1]

    if seq_tile is None:
        seq_tile = T
        for cand in (256, 128):
            if T % cand == 0:
                seq_tile = cand
                break
    assert T % seq_tile == 0
    assert seq_tile == T or seq_tile % 8 == 0
    n_t = T // seq_tile

    mdt = jnp.dtype(matmul_dtype)
    scale = 1.0 / math.sqrt(D)

    # Fold the softmax scale into the Q projection (host side, free).
    wqkv = jnp.concatenate([wq * scale, wk, wv], axis=1).astype(mdt)       # (C, 3C)
    bqkv = (jnp.concatenate([bq * scale, bk, bv], axis=0)
            .reshape(1, 3 * C).astype(jnp.float32))

    # Output-projection weight reshaped per head so the head merge fuses into it.
    wp_h = wp.reshape(n_heads, D, C).astype(mdt)                           # (N, D, C)
    w1_c = w1.astype(mdt)
    w2_c = w2.astype(mdt)

    # Lane-dense (1, C)/(1, H) layouts for 1-D params.
    bp_r = bp.reshape(1, C).astype(jnp.float32)
    b1_r = b1.reshape(1, H).astype(jnp.float32)
    b2_r = b2.reshape(1, C).astype(jnp.float32)
    g1_r = g1.reshape(1, C).astype(jnp.float32)
    be1_r = be1.reshape(1, C).astype(jnp.float32)
    g2_r = g2.reshape(1, C).astype(jnp.float32)
    be2_r = be2.reshape(1, C).astype(jnp.float32)

    f32b = jnp.dtype(jnp.float32).itemsize
    mmb = mdt.itemsize

    # ---- pass 1: fused QKV projection -------------------------------------
    qkv_cost = pl.CostEstimate(
        flops=2 * B * T * C * 3 * C,
        transcendentals=0,
        bytes_accessed=(B * T * C * f32b + C * 3 * C * mmb + 3 * C * f32b
                        + 3 * B * T * C * mmb))

    q, k, v = pl.pallas_call(
        qkv_proj_kernel,
        out_shape=(jax.ShapeDtypeStruct((B, n_heads, T, D), mdt),
                   jax.ShapeDtypeStruct((B, n_heads, T, D), mdt),
                   jax.ShapeDtypeStruct((B, n_heads, T, D), mdt)),
        grid_spec=pltpu.PrefetchScalarGridSpec(
            num_scalar_prefetch=0,
            grid=(B, n_t),
            in_specs=[
                pl.BlockSpec((1, seq_tile, C), lambda b, s: (b, s, 0)),
                pl.BlockSpec((C, 3 * C), lambda b, s: (0, 0)),
                pl.BlockSpec((1, 3 * C), lambda b, s: (0, 0)),
            ],
            out_specs=(
                pl.BlockSpec((1, n_heads, seq_tile, D), lambda b, s: (b, 0, s, 0)),
                pl.BlockSpec((1, n_heads, seq_tile, D), lambda b, s: (b, 0, s, 0)),
                pl.BlockSpec((1, n_heads, seq_tile, D), lambda b, s: (b, 0, s, 0)),
            ),
        ),
        compiler_params=pltpu.CompilerParams(
            dimension_semantics=("parallel", "parallel"),
            vmem_limit_bytes=_VMEM_LIMIT_BYTES),
        cost_estimate=qkv_cost,
    )(x, wqkv, bqkv)

    # ---- pass 2: flash attention + proj + LN1 + MLP + LN2 ------------------
    blk_cost = pl.CostEstimate(
        flops=4 * B * T * T * C + 2 * B * T * C * C + 4 * B * T * C * H,
        transcendentals=B * n_heads * T * T + B * T * H,
        bytes_accessed=(B * T * C * f32b + 3 * B * T * C * mmb
                        + (C * C + C * H + H * C) * mmb + (6 * C + H) * f32b
                        + B * T * C * f32b))

    # NOTE: for large C the grid-invariant weight blocks below would additionally be
    # single-buffered (pipeline_mode) or streamed to reduce resident VMEM.
    out = pl.pallas_call(
        attn_block_kernel,
        out_shape=jax.ShapeDtypeStruct((B, T, C), jnp.float32),
        grid_spec=pltpu.PrefetchScalarGridSpec(
            num_scalar_prefetch=0,
            grid=(B, n_t, n_t),
            in_specs=[
                pl.BlockSpec((1, seq_tile, C), lambda b, qi, ki: (b, qi, 0)),              # x
                pl.BlockSpec((1, n_heads, seq_tile, D), lambda b, qi, ki: (b, 0, qi, 0)),  # q
                pl.BlockSpec((1, n_heads, seq_tile, D), lambda b, qi, ki: (b, 0, ki, 0)),  # k
                pl.BlockSpec((1, n_heads, seq_tile, D), lambda b, qi, ki: (b, 0, ki, 0)),  # v
                pl.BlockSpec((n_heads, D, C), lambda b, qi, ki: (0, 0, 0)),                # Wproj per head
                pl.BlockSpec((1, C), lambda b, qi, ki: (0, 0)),                            # bproj
                pl.BlockSpec((1, C), lambda b, qi, ki: (0, 0)),                            # ln1 gamma
                pl.BlockSpec((1, C), lambda b, qi, ki: (0, 0)),                            # ln1 beta
                pl.BlockSpec((C, H), lambda b, qi, ki: (0, 0)),                            # mlp W1
                pl.BlockSpec((1, H), lambda b, qi, ki: (0, 0)),                            # mlp b1
                pl.BlockSpec((H, C), lambda b, qi, ki: (0, 0)),                            # mlp W2
                pl.BlockSpec((1, C), lambda b, qi, ki: (0, 0)),                            # mlp b2
                pl.BlockSpec((1, C), lambda b, qi, ki: (0, 0)),                            # ln2 gamma
                pl.BlockSpec((1, C), lambda b, qi, ki: (0, 0)),                            # ln2 beta
            ],
            out_specs=pl.BlockSpec((1, seq_tile, C), lambda b, qi, ki: (b, qi, 0)),
            scratch_shapes=[
                pltpu.VMEM((n_heads, seq_tile, 1), jnp.float32),   # m (running max)
                pltpu.VMEM((n_heads, seq_tile, 1), jnp.float32),   # l (running denom)
                pltpu.VMEM((n_heads, seq_tile, D), jnp.float32),   # acc (unnormalized out)
            ],
        ),
        compiler_params=pltpu.CompilerParams(
            dimension_semantics=("parallel", "parallel", "arbitrary"),
            vmem_limit_bytes=_VMEM_LIMIT_BYTES),
        cost_estimate=blk_cost,
    )(x, q, k, v, wp_h, bp_r, g1_r, be1_r, w1_c, b1_r, w2_c, b2_r, g2_r, be2_r)
    return out


def reference_forward(x, params, n_heads):
    (wq, bq, wk, bk, wv, bv, wp, bp,
     g1, be1, w1, b1, w2, b2, g2, be2) = params
    B, T, C = x.shape
    D = C // n_heads
    q = (x @ wq + bq).reshape(B, T, n_heads, D).transpose(0, 2, 1, 3)
    k = (x @ wk + bk).reshape(B, T, n_heads, D).transpose(0, 2, 1, 3)
    v = (x @ wv + bv).reshape(B, T, n_heads, D).transpose(0, 2, 1, 3)
    s = jnp.einsum('bntd,bnsd->bnts', q, k) / math.sqrt(D)
    mask = jnp.tril(jnp.ones((T, T), dtype=bool))
    s = jnp.where(mask[None, None], s, -jnp.inf)
    p = jax.nn.softmax(s, axis=-1)
    a = jnp.einsum('bnts,bnsd->bntd', p, v).transpose(0, 2, 1, 3).reshape(B, T, C)
    a = a @ wp + bp
    x1 = x + a
    x1n = _layernorm(x1, g1, be1)
    h = _gelu_exact(x1n @ w1 + b1)
    x2 = x1n + (h @ w2 + b2)
    return _layernorm(x2, g2, be2)


if __name__ == "__main__":
    B, T, C, n_heads = 2, 32, 32, 2
    H = 4 * C

    key = jax.random.PRNGKey(0)
    keys = jax.random.split(key, 16)

    def lin(kw, kb, fan_in, fan_out):
        # deterministic init; weight stored as (in, out) so the kernel does x @ W + b
        w = jax.random.normal(kw, (fan_in, fan_out), jnp.float32) * (1.0 / math.sqrt(fan_in))
        b = jax.random.normal(kb, (fan_out,), jnp.float32) * 0.02
        return w, b

    wq, bq = lin(keys[0], keys[1], C, C)
    wk, bk = lin(keys[2], keys[3], C, C)
    wv, bv = lin(keys[4], keys[5], C, C)
    wp, bp = lin(keys[6], keys[7], C, C)
    w1, b1 = lin(keys[8], keys[9], C, H)
    w2, b2 = lin(keys[10], keys[11], H, C)
    g1 = jnp.ones((C,), jnp.float32)
    be1 = jnp.zeros((C,), jnp.float32)
    g2 = jnp.ones((C,), jnp.float32)
    be2 = jnp.zeros((C,), jnp.float32)

    params = (wq, bq, wk, bk, wv, bv, wp, bp,
              g1, be1, w1, b1, w2, b2, g2, be2)

    x = jax.random.normal(keys[12], (B, T, C), jnp.float32)

    ref = reference_forward(x, params, n_heads)

    # 1) f32 matmuls, sequence tiled by 8: exercises the flash KV loop, masked-tile
    #    skipping and the diagonal-only causal mask.
    out_f32 = jax.block_until_ready(
        block_forward(x, params, n_heads, matmul_dtype=jnp.float32, seq_tile=8))
    np.testing.assert_allclose(np.asarray(out_f32), np.asarray(ref), rtol=5e-3, atol=5e-3)

    # 2) bf16 matmul operands (f32 accumulation; f32 softmax/LN/GELU).
    out_bf16 = jax.block_until_ready(
        block_forward(x, params, n_heads, matmul_dtype=jnp.bfloat16, seq_tile=8))
    np.testing.assert_allclose(np.asarray(out_bf16), np.asarray(ref), rtol=5e-2, atol=5e-2)

    # 3) single-tile path (tile == T), f32.
    out_one = jax.block_until_ready(
        block_forward(x, params, n_heads, matmul_dtype=jnp.float32))
    np.testing.assert_allclose(np.asarray(out_one), np.asarray(ref), rtol=5e-3, atol=5e-3)

    print("KERNEL_OK")
</pallas_src>

<mosaic_0001>
module attributes {stable_mosaic.version = 11 : i64} {
  func.func @qkv_proj_kernel(%arg0: i32, %arg1: i32, %arg2: memref<1x8x32xf32, #tpu.memory_space<vmem>>, %arg3: memref<32x96xf32, #tpu.memory_space<vmem>>, %arg4: memref<1x96xf32, #tpu.memory_space<vmem>>, %arg5: memref<1x2x8x16xf32, #tpu.memory_space<vmem>>, %arg6: memref<1x2x8x16xf32, #tpu.memory_space<vmem>>, %arg7: memref<1x2x8x16xf32, #tpu.memory_space<vmem>>) attributes {dimension_semantics = [#tpu.dimension_semantics<parallel>, #tpu.dimension_semantics<parallel>], iteration_bounds = array<i64: 2, 4>, scalar_prefetch = 0 : i64, scratch_operands = 0 : i64, tpu.core_type = #tpu.core_type<tc>, window_params = [{transform_indices = @transform_0, window_bounds = array<i64: 1, 8, 32>}, {pipeline_mode = #tpu.pipeline_mode<synchronous>, transform_indices = @transform_1, window_bounds = array<i64: 32, 96>}, {pipeline_mode = #tpu.pipeline_mode<synchronous>, transform_indices = @transform_2, window_bounds = array<i64: 1, 96>}, {transform_indices = @transform_3, window_bounds = array<i64: 1, 2, 8, 16>}, {transform_indices = @transform_4, window_bounds = array<i64: 1, 2, 8, 16>}, {transform_indices = @transform_5, window_bounds = array<i64: 1, 2, 8, 16>}]} {
    %c0 = arith.constant 0 : index
    %c0_0 = arith.constant 0 : index
    %c0_1 = arith.constant 0 : index
    %0 = vector.load %arg2[%c0, %c0_0, %c0_1] : memref<1x8x32xf32, #tpu.memory_space<vmem>>, vector<1x8x32xf32>
    %1 = vector.shape_cast %0 : vector<1x8x32xf32> to vector<8x32xf32>
    %c0_2 = arith.constant 0 : index
    %c0_3 = arith.constant 0 : index
    %2 = vector.load %arg3[%c0_2, %c0_3] : memref<32x96xf32, #tpu.memory_space<vmem>>, vector<32x96xf32>
    %cst = arith.constant dense<0.000000e+00> : vector<8x96xf32>
    %3 = tpu.matmul %1, %2, %cst {dimension_numbers = #tpu.dot_dimension_numbers<[1], [0], [0], [1], [0, 0, 1, 1], [], []>} : vector<8x32xf32>, vector<32x96xf32>, vector<8x96xf32> -> vector<8x96xf32>
    %c0_4 = arith.constant 0 : index
    %c0_5 = arith.constant 0 : index
    %4 = vector.load %arg4[%c0_4, %c0_5] : memref<1x96xf32, #tpu.memory_space<vmem>>, vector<1x96xf32>
    %5 = vector.broadcast %4 : vector<1x96xf32> to vector<8x96xf32>
    %6 = arith.addf %3, %5 : vector<8x96xf32>
    %7 = vector.extract_strided_slice %6 {offsets = [0, 0], sizes = [8, 16], strides = [1, 1]} : vector<8x96xf32> to vector<8x16xf32>
    %c0_6 = arith.constant 0 : index
    %c0_7 = arith.constant 0 : index
    %c0_8 = arith.constant 0 : index
    %c0_9 = arith.constant 0 : index
    %8 = vector.load %arg5[%c0_6, %c0_7, %c0_8, %c0_9] : memref<1x2x8x16xf32, #tpu.memory_space<vmem>>, vector<1x1x8x16xf32>
    %9 = vector.shape_cast %8 : vector<1x1x8x16xf32> to vector<8x16xf32>
    %10 = vector.shape_cast %7 : vector<8x16xf32> to vector<1x1x8x16xf32>
    tpu.vector_store %arg5[%c0_6, %c0_7, %c0_8, %c0_9], %10 {strides = array<i32>} : memref<1x2x8x16xf32, #tpu.memory_space<vmem>>, vector<1x1x8x16xf32>,
    %11 = vector.extract_strided_slice %6 {offsets = [0, 32], sizes = [8, 16], strides = [1, 1]} : vector<8x96xf32> to vector<8x16xf32>
    %c0_10 = arith.constant 0 : index
    %c0_11 = arith.constant 0 : index
    %c0_12 = arith.constant 0 : index
    %c0_13 = arith.constant 0 : index
    %12 = vector.load %arg6[%c0_10, %c0_11, %c0_12, %c0_13] : memref<1x2x8x16xf32, #tpu.memory_space<vmem>>, vector<1x1x8x16xf32>
    %13 = vector.shape_cast %12 : vector<1x1x8x16xf32> to vector<8x16xf32>
    %14 = vector.shape_cast %11 : vector<8x16xf32> to vector<1x1x8x16xf32>
    tpu.vector_store %arg6[%c0_10, %c0_11, %c0_12, %c0_13], %14 {strides = array<i32>} : memref<1x2x8x16xf32, #tpu.memory_space<vmem>>, vector<1x1x8x16xf32>,
    %15 = vector.extract_strided_slice %6 {offsets = [0, 64], sizes = [8, 16], strides = [1, 1]} : vector<8x96xf32> to vector<8x16xf32>
    %c0_14 = arith.constant 0 : index
    %c0_15 = arith.constant 0 : index
    %c0_16 = arith.constant 0 : index
    %c0_17 = arith.constant 0 : index
    %16 = vector.load %arg7[%c0_14, %c0_15, %c0_16, %c0_17] : memref<1x2x8x16xf32, #tpu.memory_space<vmem>>, vector<1x1x8x16xf32>
    %17 = vector.shape_cast %16 : vector<1x1x8x16xf32> to vector<8x16xf32>
    %18 = vector.shape_cast %15 : vector<8x16xf32> to vector<1x1x8x16xf32>
    tpu.vector_store %arg7[%c0_14, %c0_15, %c0_16, %c0_17], %18 {strides = array<i32>} : memref<1x2x8x16xf32, #tpu.memory_space<vmem>>, vector<1x1x8x16xf32>,
    %19 = vector.extract_strided_slice %6 {offsets = [0, 16], sizes = [8, 16], strides = [1, 1]} : vector<8x96xf32> to vector<8x16xf32>
    %c0_18 = arith.constant 0 : index
    %c1 = arith.constant 1 : index
    %c0_19 = arith.constant 0 : index
    %c0_20 = arith.constant 0 : index
    %20 = vector.load %arg5[%c0_18, %c1, %c0_19, %c0_20] : memref<1x2x8x16xf32, #tpu.memory_space<vmem>>, vector<1x1x8x16xf32>
    %21 = vector.shape_cast %20 : vector<1x1x8x16xf32> to vector<8x16xf32>
    %22 = vector.shape_cast %19 : vector<8x16xf32> to vector<1x1x8x16xf32>
    tpu.vector_store %arg5[%c0_18, %c1, %c0_19, %c0_20], %22 {strides = array<i32>} : memref<1x2x8x16xf32, #tpu.memory_space<vmem>>, vector<1x1x8x16xf32>,
    %23 = vector.extract_strided_slice %6 {offsets = [0, 48], sizes = [8, 16], strides = [1, 1]} : vector<8x96xf32> to vector<8x16xf32>
    %c0_21 = arith.constant 0 : index
    %c1_22 = arith.constant 1 : index
    %c0_23 = arith.constant 0 : index
    %c0_24 = arith.constant 0 : index
    %24 = vector.load %arg6[%c0_21, %c1_22, %c0_23, %c0_24] : memref<1x2x8x16xf32, #tpu.memory_space<vmem>>, vector<1x1x8x16xf32>
    %25 = vector.shape_cast %24 : vector<1x1x8x16xf32> to vector<8x16xf32>
    %26 = vector.shape_cast %23 : vector<8x16xf32> to vector<1x1x8x16xf32>
    tpu.vector_store %arg6[%c0_21, %c1_22, %c0_23, %c0_24], %26 {strides = array<i32>} : memref<1x2x8x16xf32, #tpu.memory_space<vmem>>, vector<1x1x8x16xf32>,
    %27 = vector.extract_strided_slice %6 {offsets = [0, 80], sizes = [8, 16], strides = [1, 1]} : vector<8x96xf32> to vector<8x16xf32>
    %c0_25 = arith.constant 0 : index
    %c1_26 = arith.constant 1 : index
    %c0_27 = arith.constant 0 : index
    %c0_28 = arith.constant 0 : index
    %28 = vector.load %arg7[%c0_25, %c1_26, %c0_27, %c0_28] : memref<1x2x8x16xf32, #tpu.memory_space<vmem>>, vector<1x1x8x16xf32>
    %29 = vector.shape_cast %28 : vector<1x1x8x16xf32> to vector<8x16xf32>
    %30 = vector.shape_cast %27 : vector<8x16xf32> to vector<1x1x8x16xf32>
    tpu.vector_store %arg7[%c0_25, %c1_26, %c0_27, %c0_28], %30 {strides = array<i32>} : memref<1x2x8x16xf32, #tpu.memory_space<vmem>>, vector<1x1x8x16xf32>,
    return
  }
  func.func @transform_0(%arg0: i32, %arg1: i32) -> (i32, i32, i32) {
    %c0_i32 = arith.constant 0 : i32
    %c0_i32_0 = arith.constant 0 : i32
    return %arg0, %arg1, %c0_i32 : i32, i32, i32
  }
  func.func @transform_1(%arg0: i32, %arg1: i32) -> (i32, i32) {
    %c0_i32 = arith.constant 0 : i32
    %c0_i32_0 = arith.constant 0 : i32
    %c0_i32_1 = arith.constant 0 : i32
    return %c0_i32, %c0_i32_0 : i32, i32
  }
  func.func @transform_2(%arg0: i32, %arg1: i32) -> (i32, i32) {
    %c0_i32 = arith.constant 0 : i32
    %c0_i32_0 = arith.constant 0 : i32
    %c0_i32_1 = arith.constant 0 : i32
    return %c0_i32, %c0_i32_0 : i32, i32
  }
  func.func @transform_3(%arg0: i32, %arg1: i32) -> (i32, i32, i32, i32) {
    %c0_i32 = arith.constant 0 : i32
    %c0_i32_0 = arith.constant 0 : i32
    %c0_i32_1 = arith.constant 0 : i32
    return %arg0, %c0_i32, %arg1, %c0_i32_0 : i32, i32, i32, i32
  }
  func.func @transform_4(%arg0: i32, %arg1: i32) -> (i32, i32, i32, i32) {
    %c0_i32 = arith.constant 0 : i32
    %c0_i32_0 = arith.constant 0 : i32
    %c0_i32_1 = arith.constant 0 : i32
    return %arg0, %c0_i32, %arg1, %c0_i32_0 : i32, i32, i32, i32
  }
  func.func @transform_5(%arg0: i32, %arg1: i32) -> (i32, i32, i32, i32) {
    %c0_i32 = arith.constant 0 : i32
    %c0_i32_0 = arith.constant 0 : i32
    %c0_i32_1 = arith.constant 0 : i32
    return %arg0, %c0_i32, %arg1, %c0_i32_0 : i32, i32, i32, i32
  }
}

</mosaic_0001>

<bundles_post_ra>
// kernel: tpu_custom_call.1
= control target key start
LH: loop header
LB: loop body
LE: loop exit
PB: predicated region body
PF: predicated region fallthrough
CT: control target
= control target key end

     0   :  { %s1166_s0 = inlined_call_operand.hbm [shape: f32[2,32,32], index: 0, kind: input, shape index: {}]   ;;  %s1167_s1 = inlined_call_operand.hbm [shape: f32[32,96], index: 1, kind: input, shape index: {}]   ;;  %s1168_s2 = inlined_call_operand.vmem [shape: f32[1,96], index: 2, kind: input, shape index: {}]   ;;  %s1169_s3 = inlined_call_operand.vmem [shape: f32[2,2,32,16], index: 3, kind: output, shape index: {0}]   ;;  %s1170_s4 = inlined_call_operand.vmem [shape: f32[2,2,32,16], index: 4, kind: output, shape index: {1}]   ;;  %s1171_s5 = inlined_call_operand.vmem [shape: f32[2,2,32,16], index: 5, kind: output, shape index: {2}]  }
   0x1   :  { %1173 = sst [smem:[#allocation12_spill]] %s1167_s1 }
   0x2   :  { %1174 = sst [smem:[#allocation13_spill]] %s1169_s3 }
   0x3   :  { %1175 = sst [smem:[#allocation14_spill]] %s1170_s4 }
   0x4   :  { %1176 = sst [smem:[#allocation15_spill]] %s1171_s5 }
   0x5   :  { %11 = vsyncpa [#allocation3], 0 }
   0x6   :  { %13 = vsyncpa [#allocation3 + $0x1], 0 }
   0x7   :  { %14 = vsyncpa [#allocation5], 0  ;;  %s993_s18 = smov 0   ;;  %s995_s19 = smov 0  }
   0x8   :  { %s997_s20 = smov 0   ;;  %s999_s21 = smov 0  }
   0x9   :  { %s1001_s22 = smov 0   ;;  %s1003_s23 = smov 0  }
   0xa   :  { %s1005_s24 = smov 0   ;;  %s1007_s25 = smov 0  }
   0xb LB: > { %s689_s26 = sadd.s32 4294967295, %s950_s25   ;;  %p54_p0 = scmp.ne.s32.totalorder %s926_s19, %s922_s18  ;;  %s950_s25 = sphi %s1007_s25, %s20_s25   ;;  %s946_s24 = sphi %s1005_s24, %s1198_s24   ;;  %s942_s23 = sphi %s1003_s23, %s1197_s23   ;;  %s938_s22 = sphi %s1001_s22, %s1196_s22   ;;  %s934_s21 = sphi %s999_s21, %s1195_s21   ;;  %s930_s20 = sphi %s997_s20, %s1194_s20   ;;  %s926_s19 = sphi %s995_s19, %s1193_s19   ;;  %s922_s18 = sphi %s993_s18, %s1192_s18  }
   0xc   : > { %p1033_p1 = scmp.eq.s32.totalorder %s689_s26, 0  ;;  %p691_p2 = scmp.ge.s32.totalorder %s950_s25, 1 }
   0xd   : > { %p191_p3 = scmp.lt.s32.totalorder %s950_s25, 9  ;;  %s952_s30 = smov [#allocation4]  }
   0xe   : > { %p1041_p4 = por %p1033_p1, %p54_p0  ;;  %s203_s6 = sshll.u32 %s952_s30, 4  ;;  %s204_s6 = int_to_ptr.vmem [resolvable:$true] %s203_s6 }
   0xf   : > { %p1045_p5 = pnand %p691_p2, %p191_p3  ;;  %s837_s7 = scalar_lea.vmem %s204_s6, 512 }
  0x10   : > { %p838_p9 = scmp.ne.s32.totalorder %s204_s6, %s837_s7  ;;  %p845_p12 = scmp.lt.s32.totalorder %s204_s6, %s204_s6 }
  0x11   : > { %p741_p6 = pneg %p1045_p5  ;;  %p846_p13 = scmp.lt.s32.totalorder %s837_s7, %s837_s7 }
  0x13   : > { %p742_p7 = pnand %p741_p6, %p1033_p1  ;;  %p847_p0 = por %p846_p13, %p845_p12 }
  0x15   : > { %p828_p8 = pneg %p742_p7 }
  0x17   : > { %p840_p10 = pnand %p838_p9, %p828_p8 }
  0x19   : > { %p841_p11 = pneg %p840_p10 }
  0x1b   : > { %p848_p2 = pnand %p847_p0, %p841_p11 }
  0x1d   : > { %851 = shalt.err (!%p848_p2)
}
  0x1e   : > { %s953_s8 = smov 128   ;;  %s954_s9 = smov 8  }
  0x1f   : > { %s1180_s1 = sld [smem:[#allocation12_spill]]  ;;  %p122_p3 = scmp.eq.s32.totalorder %s689_s26, 7 }
  0x20   : > { %s29_s12 = sadd.s32 1, %s942_s23  ;;  %s32_s13 = sadd.s32 1, %s946_s24 }
  0x21   : > { %p30_p6 = scmp.ge.s32.totalorder %s29_s12, 4  ;;  %p48_p8 = scmp.ne.s32.totalorder %s930_s20, %s926_s19 }
  0x22   : > { %p49_p9 = scmp.eq.s32.totalorder %s950_s25, 0  ;;  %s41_s15 = sadd.s32 1, %s930_s20 }
  0x23   : > { %s1200_s12 = smov (%p30_p6, %s29_s12), 0  ;;  %s1202_s13 = smov (!%p30_p6, %s32_s13), %s946_s24 }
  0x24   : > { %1181 = sst [smem:[#allocation11_spill]] %s1200_s12  ;;  %s37_s14 = ssub.s32 %s942_s23, %s1200_s12 }
  0x25   : > { %744 = dma.hbm_to_vmem [thread:$0]  (!%p742_p7), %s1180_s1, 512, %s204_s6, [#allocation5], %s953_s8, %s953_s8, %s954_s9  }
  0x26   : > { %p34_p10 = scmp.ge.s32.totalorder %s1202_s13, 2  ;;  %p1067_p11 = por %p122_p3, %p48_p8 }
  0x27   : > { %p1071_p7 = por %p49_p9, %p48_p8  ;;  %s220_s18 = sand.u32 1, %s930_s20  }
  0x28   : > { %s1182_s16 = scalar_select %p1067_p11, 1, 0 }
  0x29   : > { %s1204_s13 = smov (%p34_p10, %s1202_s13), 0  ;;  %p750_p12 = scmp.lt.s32.totalorder %s950_s25, 8 }
  0x2a   : > { %s694_s26 = sshll.u32 %s220_s18, 3  ;;  %s36_s30 = ssub.s32 %s946_s24, %s1204_s13 }
  0x2b   : > { %s38_s6 = sor.u32 %s37_s14, %s36_s30  ;;  %s695_s7 = sshll.u32 %s946_s24, 2 }
  0x2c   : > { %p39_p13 = scmp.eq.s32.totalorder %s38_s6, 0  ;;  %s229_s8 = sadd.s32 %s942_s23, %s695_s7 }
  0x2d   : > { %s696_s9 = sshll.u32 %s229_s8, 7  ;;  %s224_s10 = scalar_lea.vmem [#allocation2], %s694_s26 }
  0x2e   : > { %s233_s11 = sshll.u32 %s224_s10, 4  ;;  %s231_s4 = scalar_lea.hbm %s1166_s0, %s696_s9  ;;  %s234_s11 = int_to_ptr.vmem [resolvable:$true] %s233_s11 }
  0x2f   : > { %s1084_s1 = scalar_select %p39_p13, %s930_s20, %s41_s15  }
  0x30   : > { %p1093_p0 = pnand %p750_p12, %p1071_p7  ;;  %s221_s14 = scalar_lea.sflag [#allocation3], %s220_s18 }
  0x31   : > { %s865_s30 = scalar_lea.vmem %s234_s11, 128  ;;  %s955_s15 = smov [#allocation2]  }
  0x32   : > { %p854_p2 = pneg %p1093_p0  ;;  %p866_p3 = scmp.ne.s32.totalorder %s234_s11, %s865_s30 }
  0x33   : > { %s870_s26 = sshll.u32 %s955_s15, 4  ;;  %s871_s26 = int_to_ptr.vmem [resolvable:$false] %s870_s26 }
  0x34   : > { %p868_p6 = pnand %p866_p3, %p854_p2  ;;  %s872_s5 = scalar_lea.vmem %s871_s26, 256 }
  0x35   : > { %p873_p9 = scmp.lt.s32.totalorder %s234_s11, %s871_s26  ;;  %p874_p10 = scmp.lt.s32.totalorder %s872_s5, %s865_s30 }
  0x36   : > { %p869_p8 = pneg %p868_p6 }
  0x37   : > { %p875_p13 = por %p874_p10, %p873_p9 }
  0x39   : > { %p876_p11 = pnand %p875_p13, %p869_p8 }
  0x3b   : > { %879 = shalt.err (!%p876_p11)
}
  0x3c   : > { %748 = dma.hbm_to_vmem [thread:$0]  (!%p1093_p0), %s231_s4, 128, %s234_s11, %s221_s14  }
  0x3d   : > { %242 = sbr.rel (%p1045_p5) target bundleno = 415 (0x19f), region = 32  ;;  %s244_s12 = sand.u32 (!%p1045_p5), 1, %s926_s19  }
  0x3e   : > { %s698_s17 = sshll.u32 (!%p1045_p5), %s244_s12, 3  ;;  %s245_s18 = scalar_lea.sflag (!%p1045_p5), [#allocation3], %s244_s12 }
  0x3f   : > { %s248_s6 = scalar_lea.vmem (!%p1045_p5), [#allocation2], %s698_s17 }
  0x42   : > { %913 = dma.done.wait (%p1041_p4), %s245_s18, 128  }
  0x43   : > { %915 = vsyncadd (%p1041_p4), %s245_s18, 4294967168 }
  0x44   : > { %917 = dma.done.wait (%p1033_p1), [#allocation5], 512  }
  0x45   : > { %919 = vsyncadd (%p1033_p1), [#allocation5], 4294966784  ;;  %v956_v0 = vmov 0.0   ;;  %vm957_vm0 = vmmov 0   ;;  %v290_v1 = vld [vmem:[#allocation4 + $0x18] sm:$0xff]  ;;  %v289_v2 = vld [vmem:[#allocation4 + $0x10] sm:$0xff] }
  0x46   : > { %724 = vmatprep.subr.mxu0 %v956_v0  ;;  %732 = vmatprep.mubr.msk.f32.mxu0 %vm957_vm0, %v956_v0  ;;  %v288_v3 = vld [vmem:[#allocation4 + $0x8] sm:$0xff]  ;;  %v287_v4 = vld [vmem:[#allocation4] sm:$0xff]  ;;  %v286_v5 = vld [vmem:[%s248_s6] sm:$0xff]  ;;  %vm298_vm1 = vcmask 261120   ;;  %s700_s3 = sshll.u32 %s244_s12, 4  ;;  %vm372_vm2 = vcmask 130048  }
  0x47   : > { %725 = vmatpush3.msra.mxu0 %v290_v1  ;;  %v703_v6 = vld [vmem:[%s1168_s2] ss:$0 sm:$0xff]  ;;  %s958_s28 = smov 112   ;;  %s959_s29 = smov 96  }
  0x48   : > { %726 = vmatprep.subr.mxu0 %v956_v0  ;;  %s273_s7 = scalar_lea.vmem [#allocation6], %s700_s3  ;;  %s960_s8 = smov 80  }
  0x49   : > { %727 = vmatpush3.msra.mxu0 %v289_v2  ;;  %s961_s9 = smov 64   ;;  %s962_s10 = smov 48  }
  0x4a   : > { %728 = vmatprep.subr.mxu0 %v956_v0  ;;  %s279_s11 = scalar_lea.vmem [#allocation7], %s700_s3  ;;  %s285_s14 = scalar_lea.vmem [#allocation8], %s700_s3 }
  0x4b   : > { %729 = vmatpush3.msra.mxu0 %v288_v3  ;;  %p1185_p1 = scmp.ne.s32.totalorder %s1182_s16, 0 }
  0x4c   : > { %730 = vmatprep.subr.mxu0 %v956_v0  ;;  %s711_s30 = sshll.u32 (%p1185_p1), %s938_s22, 3  ;;  %s1186_s17 = sld [smem:[#allocation13_spill]] (%p1185_p1) }
  0x4d   : > { %731 = vmatpush3.msra.mxu0 %v287_v4  ;;  %s414_s15 = sadd.s32 (%p1185_p1), %s934_s21, %s711_s30 }
  0x4e   : > { %733 = vmatmul.mubr.msk.f32.vlgmr.msra.gmra.mxu0 %vm298_vm1, %v286_v5  ;;  %s712_s26 = sshll.u32 (%p1185_p1), %s414_s15, 3 }
  0x52   : > { %s416_s18 = scalar_lea.vmem (%p1185_p1), %s1186_s17, %s712_s26 }
 0x10e   : > { %v368_v7 = vpop.f32.mrf.mxu0 }
 0x10f   : > { %v369_v8 = vadd.f32 %v703_v6, %v368_v7 }
 0x110   : > { %v734_v9 = vpop.f32.mrf.mxu0 }
 0x111   : > { %383 = vrot.lane.b32.xlu1 %v369_v8, %s958_s28  ;;  %375 = vrot.lane.b32.xlu0 %v369_v8, %s959_s29  ;;  %373 = vst.msk [vmem:[%s273_s7] sm:$0xff] %vm372_vm2, %v369_v8 }
 0x115   : > { %388 = vrot.lane.b32.xlu1 %v369_v8, %s960_s8  ;;  %379 = vrot.lane.b32.xlu0 %v369_v8, %s961_s9 }
 0x118   : > { %v447_v15 = vld [vmem:[%s273_s7] sm:$0xff] (%p1185_p1) }
 0x119   : > { %393 = vrot.lane.b32.xlu0 %v369_v8, %s962_s10  ;;  %448 = vst [vmem:[%s416_s18] sm:$0xff] (%p1185_p1), %v447_v15 }
 0x183   : > { %v384_v10 = vpop.permute.xlu1 %383  ;;  %v376_v11 = vpop.permute.xlu0 %375 }
 0x184   : > { %705 = vst.msk [vmem:[%s273_s7 + $0x8] sm:$0xff] %vm372_vm2, %v384_v10  ;;  %378 = vst.msk [vmem:[%s279_s11] sm:$0xff] %vm372_vm2, %v376_v11 }
 0x187   : > { %v389_v12 = vpop.permute.xlu1 %388  ;;  %v380_v13 = vpop.permute.xlu0 %379 }
 0x188   : > { %706 = vst.msk [vmem:[%s279_s11 + $0x8] sm:$0xff] %vm372_vm2, %v389_v12  ;;  %382 = vst.msk [vmem:[%s285_s14] sm:$0xff] %vm372_vm2, %v380_v13  ;;  %412 = sbr.rel (!%p1185_p1) target bundleno = 397 (0x18d), region = 44 }
 0x18b   : > { %v394_v14 = vpop.permute.xlu0 %393  ;;  %v449_v16 = vld [vmem:[%s273_s7 + $0x8] sm:$0xff] (%p1185_p1) }
 0x18c   : > { %707 = vst.msk [vmem:[%s285_s14 + $0x8] sm:$0xff] %vm372_vm2, %v394_v14  ;;  %450 = vst [vmem:[%s416_s18 + $0x20] sm:$0xff] (%p1185_p1), %v449_v16 }
 0x18d PF: > { %p1187_p4 = scmp.ne.s32.totalorder %s1182_s16, 0 }
 0x18e   : > { %s713_s6 = sshll.u32 (%p1187_p4), %s938_s22, 3  ;;  %v491_v17 = vld [vmem:[%s279_s11] sm:$0xff] (%p1187_p4)  ;;  %s1188_s29 = sld [smem:[#allocation14_spill]] (%p1187_p4) }
 0x18f   : > { %456 = sbr.rel (!%p1187_p4) target bundleno = 406 (0x196), region = 82  ;;  %s458_s3 = sadd.s32 (%p1187_p4), %s934_s21, %s713_s6  ;;  %v493_v18 = vld [vmem:[%s279_s11 + $0x8] sm:$0xff] (%p1187_p4) }
 0x190   : > { %s714_s4 = sshll.u32 (%p1187_p4), %s458_s3, 3 }
 0x194   : > { %s460_s7 = scalar_lea.vmem %s1188_s29, %s714_s4 }
 0x195   : > { %492 = vst [vmem:[%s460_s7] sm:$0xff] %v491_v17  ;;  %494 = vst [vmem:[%s460_s7 + $0x20] sm:$0xff] %v493_v18 }
 0x196 PF: > { %p1189_p5 = scmp.ne.s32.totalorder %s1182_s16, 0 }
 0x197   : > { %s715_s8 = sshll.u32 (%p1189_p5), %s938_s22, 3  ;;  %v535_v19 = vld [vmem:[%s285_s14] sm:$0xff] (%p1189_p5)  ;;  %v537_v20 = vld [vmem:[%s285_s14 + $0x8] sm:$0xff] (%p1189_p5)  ;;  %s1190_s15 = sld [smem:[#allocation15_spill]] (%p1189_p5) }
 0x198   : > { %500 = sbr.rel (!%p1189_p5) target bundleno = 415 (0x19f), region = 120  ;;  %s502_s9 = sadd.s32 (%p1189_p5), %s934_s21, %s715_s8 }
 0x199   : > { %s716_s10 = sshll.u32 (%p1189_p5), %s502_s9, 3 }
 0x19d   : > { %s504_s26 = scalar_lea.vmem %s1190_s15, %s716_s10 }
 0x19e   : > { %536 = vst [vmem:[%s504_s26] sm:$0xff] %v535_v19  ;;  %538 = vst [vmem:[%s504_s26 + $0x20] sm:$0xff] %v537_v20 }
 0x19f PF: > { %s20_s25 = sadd.s32 1, %s950_s25   ;;  %s1191_s16 = sld [smem:[#allocation11_spill]] }
 0x1a0   : > { %p17_p11 = scmp.ge.s32.totalorder %s20_s25, 10   ;;  %s1192_s18 = smov %s926_s19 }
 0x1a1   : > { %s1193_s19 = smov %s930_s20  ;;  %s1194_s20 = smov %s1084_s1 }
 0x1a2   : > { %s1195_s21 = smov %s942_s23  ;;  %s1196_s22 = smov %s946_s24 }
 0x1a3   : > { %s1198_s24 = smov %s1204_s13  ;;  %19 = sbr.rel (!%p17_p11) target bundleno = 11 (0xb), region = 217 }
 0x1a5   : > { %s1197_s23 = smov %s1191_s16 }
 0x1a8   :  { %568 = vsyncpa [#allocation3], 1 }
 0x1a9   :  { %570 = vsyncpa [#allocation3 + $0x1], 1 }
 0x1aa   :  { %571 = vsyncpa [#allocation5], 1 }

</bundles_post_ra>
